<compile_context>
chip_gen: v7x
topology: tpu7x:2x2x1
jax: 0.10.0
libtpu: 0.0.40
codegen_flags: <defaults>
</compile_context>

<pallas_src>
import math

import jax
import jax.numpy as jnp
from jax.experimental import pallas as pl
from jax.experimental.pallas import tpu as pltpu


def _upsample_rows_kernel(x_ref, g_ref, o_ref):
    # x_ref: (Rb, g*W)        g input rows fused per kernel row
    # g_ref: (g*W, g*s*s*W)   block-diagonal 0/1 replication matrix (VMEM-resident)
    # o_ref: (Rb, g*s*s*W)    lane-dense flattened output rows
    x = x_ref[...].astype(g_ref.dtype)
    y = jnp.dot(x, g_ref[...], preferred_element_type=jnp.float32)
    o_ref[...] = y.astype(o_ref.dtype)


def _choose_row_block(total_rows, out_row_bytes, target_bytes=4 * 1024 * 1024):
    """Largest divisor of total_rows with: output block <= target_bytes,
    multiple of 8 (sublane aligned), and >=2 grid steps when possible
    (megacore).  Falls back to a single full block for tiny/odd shapes."""
    cap = max(1, target_bytes // max(out_row_bytes, 1))
    if total_rows >= 16:
        cap = min(cap, total_rows // 2)  # keep >=2 parallel grid steps
    best = None
    for d in range(1, int(math.isqrt(total_rows)) + 1):
        if total_rows % d == 0:
            for cand in (d, total_rows // d):
                if cand <= cap and cand % 8 == 0 and (best is None or cand > best):
                    best = cand
    return best if best is not None else total_rows


def _choose_group(total_rows, W, w_out, g_bytes_cap=4 * 1024 * 1024):
    """Fuse g input rows per kernel row so g*w_out is a multiple of 128 lanes
    (unmasked stores).  Only if it divides the row count and keeps the
    block-diagonal G matrix small; otherwise g=1 (still correct)."""
    if w_out % 128 == 0:
        return 1
    g = 128 // math.gcd(w_out, 128)
    if g <= 1 or total_rows % g != 0:
        return 1
    if (g * W) * (g * w_out) * 4 > g_bytes_cap:
        return 1
    return g


def upsample_nearest(x, scale_factor):
    """Equivalent of F.interpolate(x, scale_factor=s, mode='nearest'), NCHW."""
    assert float(scale_factor) == int(scale_factor), "only integer scale factors"
    s = int(scale_factor)
    N, C, H, W = x.shape
    if s == 1:
        return x

    dtype = x.dtype
    itemsize = jnp.dtype(dtype).itemsize
    total_rows = N * C * H
    w_out = s * s * W  # all s*s*W output elements produced by one input row

    # Replication happens in the input dtype for floats (exact: exactly one
    # 1.0 term per output).  Integer dtypes go through f32.
    # TODO(synk): int inputs with |x| >= 2^24 lose precision through f32.
    compute_dtype = dtype if jnp.issubdtype(dtype, jnp.floating) else jnp.float32

    # Lane-density grouping: g input rows per kernel row.
    g = _choose_group(total_rows, W, w_out)
    gW, gWout = g * W, g * w_out
    grouped_rows = total_rows // g

    # Block-diagonal one-hot replication matrix:
    #   out[p, b*w_out + j] = x[p, b*W + (j % (s*W)) // s]
    cols = jnp.arange(gWout, dtype=jnp.int32)
    src = (cols // w_out) * W + ((cols % w_out) % (s * W)) // s
    G = (src[None, :] == jnp.arange(gW, dtype=jnp.int32)[:, None]).astype(compute_dtype)

    # Free reshape: NCHW is contiguous over (C, H, W).
    x2 = x.reshape(grouped_rows, gW)

    rb = _choose_row_block(grouped_rows, gWout * itemsize)
    grid = (grouped_rows // rb,)

    cost = pl.CostEstimate(
        flops=2 * grouped_rows * gW * gWout,
        transcendentals=0,
        bytes_accessed=int((1 + s * s) * x.size * itemsize + G.size * G.dtype.itemsize),
    )

    out2 = pl.pallas_call(
        _upsample_rows_kernel,
        out_shape=jax.ShapeDtypeStruct((grouped_rows, gWout), dtype),
        grid=grid,
        in_specs=[
            pl.BlockSpec((rb, gW), lambda i: (i, 0)),
            pl.BlockSpec((gW, gWout), lambda i: (0, 0)),  # fetched once, stays in VMEM
        ],
        out_specs=pl.BlockSpec((rb, gWout), lambda i: (i, 0)),
        compiler_params=pltpu.CompilerParams(dimension_semantics=("parallel",)),
        cost_estimate=cost,
    )(x2, G)

    # Free reshape: (grouped_rows, g*s*s*W) and (N, C, H*s, W*s) share layout.
    return out2.reshape(N, C, H * s, W * s)


class UpsamplePallas:
    """Mirror of the PyTorch Upsample module (mode='nearest' only)."""

    def __init__(self, scale_factor, mode="nearest"):
        assert mode == "nearest", "only nearest mode is implemented"
        # TODO(synk): bilinear / non-integer scale factors not implemented.
        self.scale_factor = scale_factor
        self.mode = mode

    def __call__(self, x):
        return upsample_nearest(x, self.scale_factor)


if __name__ == "__main__":
    key = jax.random.PRNGKey(0)

    # Case 1: main test (grouped, lane-dense path: w_out=64 -> g=2 -> 128 lanes)
    N, C, H, W = 2, 4, 16, 16
    scale = 2
    x = jax.random.normal(key, (N, C, H, W), dtype=jnp.float32)
    mod = UpsamplePallas(scale_factor=scale, mode="nearest")
    y = jax.block_until_ready(mod(x))
    ref = jnp.repeat(jnp.repeat(x, scale, axis=2), scale, axis=3)
    assert y.shape == (N, C, H * scale, W * scale), y.shape
    assert jnp.allclose(y, ref, atol=1e-6), "mismatch vs reference (case 1)"

    # Case 2: odd scale / small plane (exercises the g=1 fallback path)
    x2 = jax.random.normal(jax.random.PRNGKey(1), (1, 3, 8, 8), dtype=jnp.float32)
    mod3 = UpsamplePallas(scale_factor=3, mode="nearest")
    y2 = jax.block_until_ready(mod3(x2))
    ref2 = jnp.repeat(jnp.repeat(x2, 3, axis=2), 3, axis=3)
    assert y2.shape == (1, 3, 24, 24), y2.shape
    assert jnp.allclose(y2, ref2, atol=1e-6), "mismatch vs reference (case 2)"

    print("KERNEL_OK")
</pallas_src>

<mosaic_0001>
module attributes {stable_mosaic.version = 11 : i64} {
  func.func @_upsample_rows_kernel(%arg0: i32, %arg1: memref<32x32xf32, #tpu.memory_space<vmem>>, %arg2: memref<32x128xf32, #tpu.memory_space<vmem>>, %arg3: memref<32x128xf32, #tpu.memory_space<vmem>>) attributes {dimension_semantics = [#tpu.dimension_semantics<parallel>], iteration_bounds = array<i64: 2>, scalar_prefetch = 0 : i64, scratch_operands = 0 : i64, tpu.core_type = #tpu.core_type<tc>, window_params = [{transform_indices = @transform_0, window_bounds = array<i64: 32, 32>}, {pipeline_mode = #tpu.pipeline_mode<synchronous>, transform_indices = @transform_1, window_bounds = array<i64: 32, 128>}, {transform_indices = @transform_2, window_bounds = array<i64: 32, 128>}]} {
    %c0 = arith.constant 0 : index
    %c0_0 = arith.constant 0 : index
    %0 = vector.load %arg1[%c0, %c0_0] : memref<32x32xf32, #tpu.memory_space<vmem>>, vector<32x32xf32>
    %c0_1 = arith.constant 0 : index
    %c0_2 = arith.constant 0 : index
    %1 = vector.load %arg2[%c0_1, %c0_2] : memref<32x128xf32, #tpu.memory_space<vmem>>, vector<32x128xf32>
    %cst = arith.constant dense<0.000000e+00> : vector<32x128xf32>
    %2 = tpu.matmul %0, %1, %cst {dimension_numbers = #tpu.dot_dimension_numbers<[1], [0], [0], [1], [0, 0, 1, 1], [], []>} : vector<32x32xf32>, vector<32x128xf32>, vector<32x128xf32> -> vector<32x128xf32>
    %c0_3 = arith.constant 0 : index
    %c0_4 = arith.constant 0 : index
    %3 = vector.load %arg3[%c0_3, %c0_4] : memref<32x128xf32, #tpu.memory_space<vmem>>, vector<32x128xf32>
    tpu.vector_store %arg3[%c0_3, %c0_4], %2 {strides = array<i32>} : memref<32x128xf32, #tpu.memory_space<vmem>>, vector<32x128xf32>,
    return
  }
  func.func @transform_0(%arg0: i32) -> (i32, i32) {
    %c0_i32 = arith.constant 0 : i32
    %c0_i32_0 = arith.constant 0 : i32
    return %arg0, %c0_i32 : i32, i32
  }
  func.func @transform_1(%arg0: i32) -> (i32, i32) {
    %c0_i32 = arith.constant 0 : i32
    %c0_i32_0 = arith.constant 0 : i32
    %c0_i32_1 = arith.constant 0 : i32
    return %c0_i32, %c0_i32_0 : i32, i32
  }
  func.func @transform_2(%arg0: i32) -> (i32, i32) {
    %c0_i32 = arith.constant 0 : i32
    %c0_i32_0 = arith.constant 0 : i32
    return %arg0, %c0_i32 : i32, i32
  }
}

</mosaic_0001>

<bundles_post_ra>
// kernel: tpu_custom_call.1
= control target key start
LH: loop header
LB: loop body
LE: loop exit
PB: predicated region body
PF: predicated region fallthrough
CT: control target
= control target key end

     0   :  { %7 = vsyncpa [#allocation3], 0  ;;  %s619_s0 = inlined_call_operand.vmem [shape: f32[64,32], index: 0, kind: input, shape index: {}]   ;;  %s620_s1 = inlined_call_operand.vmem [shape: f32[32,128], index: 1, kind: input, shape index: {}]   ;;  %s621_s2 = inlined_call_operand.hbm [shape: f32[64,128], index: 2, kind: output, shape index: {}]  }
   0x1   :  { %9 = vsyncpa [#allocation3 + $0x1], 0  ;;  %s505_s9 = smov 0   ;;  %s507_s10 = smov 0  }
   0x2   :  { %s509_s11 = smov 0   ;;  %s511_s12 = smov 0  }
   0x3 LB: > { %s526_s13 = sadd.s32 4294967295, %s485_s12   ;;  %s331_s14 = sadd.s32 4294967294, %s485_s12   ;;  %s485_s12 = sphi %s511_s12, %s627_s12   ;;  %s481_s11 = sphi %s509_s11, %s626_s11   ;;  %s477_s10 = sphi %s507_s10, %s625_s10   ;;  %s473_s9 = sphi %s505_s9, %s624_s9  }
   0x4   : > { %s530_s15 = sadd.s32 1, %s485_s12   ;;  %s69_s16 = sadd.s32 1, %s481_s11 }
   0x5   : > { %s66_s17 = ssub.s32 %s485_s12, %s530_s15  ;;  %p79_p0 = scmp.ne.s32.totalorder %s481_s11, %s477_s10 }
   0x6   : > { %p67_p1 = scmp.eq.s32.totalorder %s66_s17, 0  ;;  %p80_p2 = scmp.eq.s32.totalorder %s526_s13, 1 }
   0x7   : > { %p85_p3 = scmp.ne.s32.totalorder %s477_s10, %s473_s9  ;;  %p86_p4 = scmp.eq.s32.totalorder %s331_s14, 1 }
   0x8   : > { %s541_s18 = scalar_select %p67_p1, %s481_s11, %s69_s16  }
   0x9   : > { %p543_p5 = por %p80_p2, %p79_p0  ;;  %p547_p6 = por %p86_p4, %p85_p3 }
   0xa   : > { %p334_p7 = scmp.ge.s32.totalorder %s485_s12, 1  ;;  %p116_p8 = scmp.lt.s32.totalorder %s485_s12, 3 }
   0xc   : > { %p117_p9 = pnand %p334_p7, %p116_p8 }
   0xd   : > { %v149_v0 = vld [vmem:[%s620_s1] sm:$0xff] (!%p117_p9)  ;;  %v150_v1 = vld [vmem:[%s620_s1 + $0x8] sm:$0xff] (!%p117_p9)  ;;  %v151_v2 = vld [vmem:[%s620_s1 + $0x10] sm:$0xff] (!%p117_p9)  ;;  %s336_s27 = sshll.u32 (!%p117_p9), %s526_s13, 2  ;;  %vm153_vm0 = vcmask (!%p117_p9), 261120   ;;  %s135_s6 = sand.u32 (!%p117_p9), 1, %s477_s10  }
   0xe   : > { %120 = sbr.rel (%p117_p9) target bundleno = 254 (0xfe), region = 28  ;;  %v370_v3 = vpack.c.bf16 (!%p117_p9), %v150_v1, %v149_v0  ;;  %v152_v4 = vld [vmem:[%s620_s1 + $0x18] sm:$0xff] (!%p117_p9)  ;;  %p139_p10 = scmp.lt.s32.totalorder (!%p117_p9), %s336_s27, 7 }
   0xf   : > { %v374_v5 = vpack.c.bf16 (!%p117_p9), %v152_v4, %v151_v2  ;;  %s335_s7 = sshll.u32 (!%p117_p9), %s135_s6, 5  ;;  %s347_s16 = sshll.u32 (!%p117_p9), %s526_s13, 9 }
  0x10   : > { %371 = vmatprep.subr.bf16.mxu0 (!%p117_p9), %v370_v3  ;;  %378 = vmatprep.subr.bf16.mxu1 (!%p117_p9), %v370_v3  ;;  %s137_s8 = scalar_lea.vmem (!%p117_p9), [#allocation2], %s335_s7  ;;  %s576_s22 = scalar_lea.hbm (!%p117_p9), %s621_s2, %s347_s16 }
  0x11   : > { %373 = vmatpush3.bf16.msra.mxu0 (!%p117_p9), %v370_v3  ;;  %380 = vmatpush3.bf16.msra.mxu1 (!%p117_p9), %v370_v3  ;;  %s269_s14 = sshll.u32 (!%p117_p9), %s137_s8, 4  ;;  %s578_s23 = scalar_lea.sflag (!%p117_p9), [#allocation3], %s135_s6  ;;  %s571_s14 = int_to_ptr.vmem [resolvable:$true] %s269_s14 }
  0x12   : > { %375 = vmatprep.subr.bf16.mxu0 (!%p117_p9), %v374_v5  ;;  %379 = vmatprep.subr.bf16.mxu1 (!%p117_p9), %v374_v5  ;;  %s423_s13 = scalar_lea.vmem (!%p117_p9), %s571_s14, 512  ;;  %s487_s24 = smov (!%p117_p9), [#allocation2]  }
  0x13   : > { %p424_p11 = scmp.ne.s32.totalorder (!%p117_p9), %s571_s14, %s423_s13  ;;  %s427_s25 = sshll.u32 (!%p117_p9), %s487_s24, 4  ;;  %s428_s25 = int_to_ptr.vmem [resolvable:$false] %s427_s25 }
  0x14   : > { %s429_s26 = scalar_lea.vmem (!%p117_p9), %s428_s25, 1024  ;;  %p430_p0 = scmp.lt.s32.totalorder (!%p117_p9), %s571_s14, %s428_s25 }
  0x15   : > { %s629_s27 = smov (!%p139_p10, %s336_s27), 7  ;;  %377 = vmatpush3.bf16.msra.mxu0 %v374_v5  ;;  %381 = vmatpush3.bf16.msra.mxu1 %v374_v5  ;;  %p425_p12 = pnand %p424_p11, %p543_p5 }
  0x16   : > { %s337_s30 = sshll.u32 %s629_s27, 3  ;;  %p431_p1 = scmp.lt.s32.totalorder %s429_s26, %s423_s13 }
  0x17   : > { %s142_s5 = scalar_lea.vmem %s619_s0, %s337_s30  ;;  %p426_p13 = pneg %p425_p12 }
  0x18   : > { %v145_v6 = vld [vmem:[%s142_s5] sm:$0xff]  ;;  %v147_v7 = vld [vmem:[%s142_s5 + $0x10] sm:$0xff]  ;;  %v146_v8 = vld [vmem:[%s142_s5 + $0x8] sm:$0xff]  ;;  %p432_p2 = por %p431_p1, %p430_p0 }
  0x19   : > { %v148_v9 = vld [vmem:[%s142_s5 + $0x18] sm:$0xff]  ;;  %364 = vmatprep.mubr.msk.f32.mxu0 %vm153_vm0, %v145_v6  ;;  %367 = vmatprep.mubr.msk.f32.mxu1 %vm153_vm0, %v147_v7 }
  0x1a   : > { %365 = vmatmul.mubr.msk.f32.vlgmr.msra.gmra.mrb[0].mxu0 %vm153_vm0, %v146_v8  ;;  %368 = vmatmul.mubr.msk.f32.vlgmr.msra.gmra.mrb[0].mxu1 %vm153_vm0, %v148_v9  ;;  %p433_p3 = pnand %p432_p2, %p426_p13 }
  0xed   : > { %v366_v10 = vpop.f32.mrb[0].mxu0  ;;  %v369_v11 = vpop.f32.mrb[0].mxu1 }
  0xee   : > { %252 = vst [vmem:[%s137_s8 + $0x8] sm:$0xff] %v366_v10  ;;  %254 = vst [vmem:[%s137_s8 + $0x18] sm:$0xff] %v369_v11  ;;  %v232_v12 = vpop.f32.mrb[1].mxu0  ;;  %v242_v13 = vpop.f32.mrb[1].mxu1 }
  0xef   : > { %251 = vst [vmem:[%s137_s8] sm:$0xff] %v232_v12  ;;  %253 = vst [vmem:[%s137_s8 + $0x10] sm:$0xff] %v242_v13 }
  0xf0   : > { %436 = shalt.err (!%p433_p3)
}
  0xf1   : > { %s437_s27 = scalar_lea.hbm %s576_s22, 512  ;;  %s441_s30 = scalar_lea.hbm %s621_s2, 1024 }
  0xf2   : > { %p438_p4 = scmp.ne.s32.totalorder %s576_s22, %s437_s27  ;;  %p442_p9 = scmp.lt.u32.totalorder %s576_s22, %s621_s2 }
  0xf3   : > { %p443_p10 = scmp.lt.u32.totalorder %s441_s30, %s437_s27  ;;  %p445_p12 = scmp.lt.u32.totalorder %s437_s27, %s576_s22 }
  0xf4   : > { %p439_p7 = pnand %p438_p4, %p543_p5 }
  0xf5   : > { %p444_p11 = por %p443_p10, %p442_p9 }
  0xf6   : > { %p440_p8 = pneg %p439_p7 }
  0xf7   : > { %p446_p13 = por %p445_p12, %p444_p11 }
  0xf9   : > { %p447_p0 = pnand %p446_p13, %p440_p8 }
  0xfb   : > { %450 = shalt.err (!%p447_p0)
}
  0xfc   : > { %s488_s5 = smov 128   ;;  %s489_s6 = smov 8  }
  0xfd   : > { %382 = dma.vmem_to_hbm [thread:$0]  (%p543_p5), %s571_s14, 512, %s576_s22, %s578_s23, %s488_s5, %s488_s5, %s489_s6  }
  0xfe PF: > { %p388_p1 = scmp.ge.s32.totalorder %s485_s12, 2  ;;  %s284_s7 = sand.u32 1, %s473_s9  }
  0xff   : > { %s285_s8 = scalar_lea.sflag [#allocation3], %s284_s7 }
 0x100   : > { %p385_p2 = pnand %p388_p1, %p547_p6 }
 0x102   : > { %468 = dma.done.wait (!%p385_p2), %s285_s8, 512  }
 0x103   : > { %470 = vsyncadd (!%p385_p2), %s285_s8, 4294966784  ;;  %p12_p3 = scmp.ge.s32.totalorder %s530_s15, 4   ;;  %s624_s9 = smov %s477_s10 }
 0x104   : > { %s625_s10 = smov %s481_s11  ;;  %s626_s11 = smov %s541_s18 }
 0x105   : > { %s627_s12 = smov %s530_s15  ;;  %14 = sbr.rel (!%p12_p3) target bundleno = 3 (0x3), region = 63 }
 0x10c   :  { %290 = vsyncpa [#allocation3], 1 }
 0x10d   :  { %292 = vsyncpa [#allocation3 + $0x1], 1 }

</bundles_post_ra>
